<compile_context>
chip_gen: v7x
topology: tpu7x:2x2x1
jax: 0.10.0
libtpu: 0.0.40
codegen_flags: <defaults>
</compile_context>

<pallas_src>
import jax
import jax.numpy as jnp
from jax import lax
from jax.experimental import pallas as pl
from jax.experimental.pallas import tpu as pltpu

NEG = -1.0e30  # finite "minus infinity" -> no -inf - -inf = nan on the VPU


def _round_up(x, m):
    return ((x + m - 1) // m) * m


# --------- Kernel 1: fused linear + log_softmax + extended-label gather -------
def _proj_lsm_gather_kernel(x_ref, w_ref, b_ref, wg_ref, bg_ref, o_ref):
    # x_ref  : (1, Tt, D)   bf16 activations
    # w_ref  : (D, O)       bf16 full projection weights (log-softmax denominator)
    # b_ref  : (1, O)       f32 bias
    # wg_ref : (1, D, Sp)   bf16 gathered weight columns W[:, ext[b, s]]
    # bg_ref : (1, 1, Sp)   f32 gathered bias bias[ext[b, s]]
    # o_ref  : (1, Tt, Sp)  f32 lp_ext[t, s] = log_softmax(x W + b)[t, ext[s]]
    x = x_ref[0]                                                         # (Tt, D) bf16
    z = jnp.dot(x, w_ref[...], preferred_element_type=jnp.float32)      # bf16 MXU, f32 acc
    z = z + b_ref[...]                                                   # (Tt, O)
    m = jnp.max(z, axis=-1, keepdims=True)
    lse = m + jnp.log(jnp.sum(jnp.exp(z - m), axis=-1, keepdims=True))   # (Tt, 1)
    # gathered logits: exact same bf16 columns / f32 accumulation as the full
    # matmul, so this equals a gather of z (+ gathered bias) bit-for-bit.
    z_ext = jnp.dot(x, wg_ref[0], preferred_element_type=jnp.float32)    # (Tt, Sp)
    z_ext = z_ext + bg_ref[0]
    o_ref[0] = z_ext - lse


def ctc_logprobs_ext(hs_bf16, w_bf16, bias, wg_bf16, bg, *, tt):
    """hs: (Bp, Tp, D) bf16 -> lp_ext: (Bp, Tp, Sp) f32."""
    Bp, Tp, D = hs_bf16.shape
    O = w_bf16.shape[1]
    Sp = wg_bf16.shape[2]
    # TODO(synk): for very large odim, tile O with a two-pass log-softmax so the
    # (D, O) weight block does not have to stay fully VMEM-resident.
    vmem1 = (2 * (tt * D * 2 + D * O * 2 + O * 4 + D * Sp * 2 + Sp * 4 + tt * Sp * 4)
             + 3 * tt * O * 4)
    vmem1 = int(min(max(vmem1 + (8 << 20), 32 << 20), 112 << 20))
    return pl.pallas_call(
        _proj_lsm_gather_kernel,
        out_shape=jax.ShapeDtypeStruct((Bp, Tp, Sp), jnp.float32),
        grid=(Bp, Tp // tt),
        in_specs=[
            pl.BlockSpec((1, tt, D), lambda b, t: (b, t, 0)),
            pl.BlockSpec((D, O), lambda b, t: (0, 0)),
            pl.BlockSpec((1, O), lambda b, t: (0, 0)),
            pl.BlockSpec((1, D, Sp), lambda b, t: (b, 0, 0)),
            pl.BlockSpec((1, 1, Sp), lambda b, t: (b, 0, 0)),
        ],
        out_specs=pl.BlockSpec((1, tt, Sp), lambda b, t: (b, t, 0)),
        compiler_params=pltpu.CompilerParams(
            dimension_semantics=("parallel", "parallel"),
            vmem_limit_bytes=vmem1),
    )(hs_bf16, w_bf16, bias, wg_bf16, bg)


# --------- Kernel 2: CTC forward (alpha) DP, streamed over time ---------------
def _ctc_dp_kernel(lp_ref, skip_ref, hl_ref, sl_ref, wm_ref, out_ref, alpha_ref):
    # lp_ref   : (Bb, Tt, Sp) lp_ext slab for this (batch-block, time-block)
    # skip_ref : (Bb, Sp)     0 where the s-2 -> s transition is allowed, NEG otherwise
    # hl_ref   : (Bb, 1) i32  input lengths
    # sl_ref   : (Bb, 1) i32  extended target lengths 2*olen+1
    # wm_ref   : (Bb, 1) f32  per-sequence weight (1/B for real rows, 0 for pad rows)
    # out_ref  : (1, 1)  f32  partial loss for this batch block
    # alpha_ref: (Bb, Sp) f32 scratch carrying the DP state across grid steps
    ti = pl.program_id(1)
    Bb, Tt, Sp = lp_ref.shape
    pos = lax.broadcasted_iota(jnp.int32, (Bb, Sp), 1)
    sl = sl_ref[...]
    hl = hl_ref[...]
    skip = skip_ref[...]

    @pl.when(ti == 0)
    def _init():
        alpha_ref[...] = jnp.where((pos < 2) & (pos < sl), lp_ref[:, 0, :], NEG)

    def step(tl, alpha):
        t = ti * Tt + tl
        lp_t = lp_ref[:, pl.ds(tl, 1), :][:, 0, :]                      # (Bb, Sp)
        a1 = alpha
        a2 = jnp.where(pos >= 1, pltpu.roll(alpha, 1, 1), NEG)          # alpha[s-1]
        a3 = jnp.where(pos >= 2, pltpu.roll(alpha, 2, 1), NEG) + skip   # alpha[s-2]
        # 3-way logsumexp with only 2 exp: exp(max - max) == 1 is folded out.
        b23 = jnp.maximum(a2, a3)
        m = jnp.maximum(a1, b23)
        o1 = jnp.minimum(a1, b23)
        o2 = jnp.minimum(a2, a3)
        lse = m + jnp.log(1.0 + jnp.exp(o1 - m) + jnp.exp(o2 - m))
        new = lse + lp_t
        keep = jnp.logical_and(t >= 1, t < hl)       # t=0 is the init; freeze t>=hlen
        return jnp.where(keep, new, alpha)

    alpha_ref[...] = lax.fori_loop(0, Tt, step, alpha_ref[...], unroll=4)

    @pl.when(ti == pl.num_programs(1) - 1)
    def _finalize():
        alpha = alpha_ref[...]
        fin = (pos == sl - 1) | (pos == sl - 2)
        masked = jnp.where(fin, alpha, NEG)
        m = jnp.max(masked, axis=1, keepdims=True)
        ll = m + jnp.log(jnp.sum(jnp.exp(masked - m), axis=1, keepdims=True))  # (Bb,1)
        out_ref[...] = jnp.sum((-ll) * wm_ref[...], keepdims=True)             # sum/B


def ctc_loss_from_lp_ext(lp_ext, skip, hl, sl, wm, *, tt, nb):
    Bp, Tp, Sp = lp_ext.shape
    Bb = Bp // nb
    vmem2 = 2 * (Bb * tt * Sp * 4 + Bb * Sp * 4 + 3 * Bb * 4) + Bb * Sp * 4
    vmem2 = int(min(max(vmem2 + (8 << 20), 32 << 20), 112 << 20))
    partials = pl.pallas_call(
        _ctc_dp_kernel,
        out_shape=jax.ShapeDtypeStruct((nb, 1), jnp.float32),
        grid=(nb, Tp // tt),
        in_specs=[
            pl.BlockSpec((Bb, tt, Sp), lambda b, t: (b, t, 0)),
            pl.BlockSpec((Bb, Sp), lambda b, t: (b, 0)),
            pl.BlockSpec((Bb, 1), lambda b, t: (b, 0)),
            pl.BlockSpec((Bb, 1), lambda b, t: (b, 0)),
            pl.BlockSpec((Bb, 1), lambda b, t: (b, 0)),
        ],
        out_specs=pl.BlockSpec((1, 1), lambda b, t: (b, 0)),
        scratch_shapes=[pltpu.VMEM((Bb, Sp), jnp.float32)],
        compiler_params=pltpu.CompilerParams(
            dimension_semantics=("parallel", "arbitrary"),
            vmem_limit_bytes=vmem2),
    )(lp_ext, skip, hl, sl, wm)
    return jnp.sum(partials)


# ------------------------------- Module wrapper -------------------------------
class CTCPallas:
    """Pallas equivalent of espnet2.asr.ctc.CTC (ctc_type='builtin', reduce=True)."""

    def __init__(self, odim, encoder_output_size, dropout_rate=0.0, *, key):
        self.odim = odim
        self.eprojs = encoder_output_size
        self.dropout_rate = dropout_rate
        # TODO(synk): training-mode dropout with p>0 (PRNG mask) not implemented; p=0.0 is identity.
        k_w, k_b = jax.random.split(key)
        self.w = jax.random.normal(k_w, (encoder_output_size, odim), jnp.float32) * 0.1
        self.b = jax.random.normal(k_b, (odim,), jnp.float32) * 0.01

    def forward(self, hs_pad, hlens, ys_pad, ys_lens):
        B, T, D = hs_pad.shape
        O = self.odim
        Lmax = ys_pad.shape[1]
        S = 2 * Lmax + 1

        # Padding: batch -> sublane multiple, S -> lane multiple (128), T -> time tile.
        Bp = _round_up(B, 8)
        Sp = _round_up(S, 128)
        Tt = 256 if T >= 256 else _round_up(T, 8)   # large MXU row tile
        Tp = _round_up(T, Tt)
        Tt2 = 128 if Tt == 256 else Tt              # smaller DP slab bounds VMEM residency
        nb = 2 if Bp % 16 == 0 else 1               # batch-block split for v7x dual-TC

        # Activations stored in bf16 (the MXU rounds them anyway) -> half the DMA.
        hs = jnp.zeros((Bp, Tp, D), jnp.bfloat16).at[:B, :T, :].set(
            hs_pad.astype(jnp.bfloat16))

        # Extended (blank-interleaved) label sequence, its gathered weight
        # columns / bias and the "skip" (s-2 -> s) transition mask.  ignore_id=-1
        # labels are clipped; those states sit beyond sl and are never used.
        ys_i = ys_pad.astype(jnp.int32)
        ext = jnp.zeros((B, S), jnp.int32).at[:, 1::2].set(ys_i)
        ext_c = jnp.clip(ext, 0, O - 1)

        w_bf = self.w.astype(jnp.bfloat16)                               # (D, O)
        wg = jnp.transpose(w_bf[:, ext_c], (1, 0, 2))                    # (B, D, S) bf16
        wg_p = jnp.zeros((Bp, D, Sp), jnp.bfloat16).at[:B, :, :S].set(wg)
        bg = self.b[ext_c].astype(jnp.float32)                           # (B, S)
        bg_p = jnp.zeros((Bp, 1, Sp), jnp.float32).at[:B, 0, :S].set(bg)

        ext_m2 = jnp.pad(ext, ((0, 0), (2, 0)))[:, :S]
        s_idx = jnp.arange(S)
        allow = (s_idx % 2 == 1) & (s_idx >= 2) & (ext != ext_m2)
        skip = jnp.full((Bp, Sp), NEG, jnp.float32).at[:B, :S].set(
            jnp.where(allow, 0.0, NEG).astype(jnp.float32))

        hl = jnp.zeros((Bp, 1), jnp.int32).at[:B, 0].set(hlens.astype(jnp.int32))
        sl = jnp.ones((Bp, 1), jnp.int32).at[:B, 0].set(
            2 * ys_lens.astype(jnp.int32) + 1)
        wm = jnp.zeros((Bp, 1), jnp.float32).at[:B, 0].set(1.0 / B)     # sum reduce / B

        lp_ext = ctc_logprobs_ext(
            hs, w_bf, self.b.reshape(1, O).astype(jnp.float32), wg_p, bg_p, tt=Tt)
        loss = ctc_loss_from_lp_ext(lp_ext, skip, hl, sl, wm, tt=Tt2, nb=nb)
        return loss.astype(hs_pad.dtype)


# --------------------------- pure-JAX reference (check) -----------------------
def _ctc_reference(hs_pad, hlens, ys_pad, ys_lens, w, bias, odim):
    B, T, _ = hs_pad.shape
    O = odim
    hsq = hs_pad.astype(jnp.bfloat16).astype(jnp.float32)
    wq = w.astype(jnp.bfloat16).astype(jnp.float32)
    logits = jnp.einsum("btd,do->bto", hsq, wq) + bias[None, None, :]
    logp = jax.nn.log_softmax(logits, axis=-1)

    Lmax = ys_pad.shape[1]
    S = 2 * Lmax + 1
    ys_i = ys_pad.astype(jnp.int32)
    ext = jnp.zeros((B, S), jnp.int32).at[:, 1::2].set(ys_i)
    extc = jnp.clip(ext, 0, O - 1)
    lp_ext = jnp.take_along_axis(logp, extc[:, None, :], axis=2)        # (B, T, S)

    ext_m2 = jnp.pad(ext, ((0, 0), (2, 0)))[:, :S]
    s_idx = jnp.arange(S)
    allow = (s_idx % 2 == 1) & (s_idx >= 2) & (ext != ext_m2)
    skip = jnp.where(allow, 0.0, NEG).astype(jnp.float32)

    sl = (2 * ys_lens.astype(jnp.int32) + 1)[:, None]
    hl = hlens.astype(jnp.int32)[:, None]
    pos = jnp.arange(S)[None, :]

    alpha = jnp.where((pos < 2) & (pos < sl), lp_ext[:, 0, :], NEG)
    negcol = jnp.full((B, 1), NEG, jnp.float32)

    def body(t, alpha):
        a1 = alpha
        a2 = jnp.concatenate([negcol, alpha[:, :-1]], axis=1)
        a3 = jnp.concatenate([negcol, negcol, alpha[:, :-2]], axis=1) + skip
        m = jnp.maximum(a1, jnp.maximum(a2, a3))
        lse = m + jnp.log(jnp.exp(a1 - m) + jnp.exp(a2 - m) + jnp.exp(a3 - m))
        new = lse + lp_ext[:, t, :]
        return jnp.where(t < hl, new, alpha)

    alpha = lax.fori_loop(1, T, body, alpha)
    fin = (pos == sl - 1) | (pos == sl - 2)
    masked = jnp.where(fin, alpha, NEG)
    m = jnp.max(masked, axis=1)
    ll = m + jnp.log(jnp.sum(jnp.exp(masked - m[:, None]), axis=1))
    return jnp.sum(-ll) / B


if __name__ == "__main__":
    key = jax.random.PRNGKey(0)
    k_mod, k_hs, k_ys = jax.random.split(key, 3)

    B, T, D, O, Lmax = 2, 8, 32, 16, 4          # odim=16 (blank id = 0), eprojs=32
    hs_pad = jax.random.normal(k_hs, (B, T, D), jnp.float32)
    hlens = jnp.array([8, 6], jnp.int32)
    ys_pad = jax.random.randint(k_ys, (B, Lmax), 1, O)     # labels in [1, O-1]
    ys_lens = jnp.array([3, 4], jnp.int32)

    ctc = CTCPallas(odim=O, encoder_output_size=D, dropout_rate=0.0, key=k_mod)
    loss = jax.block_until_ready(ctc.forward(hs_pad, hlens, ys_pad, ys_lens))

    ref = float(jax.block_until_ready(
        _ctc_reference(hs_pad, hlens, ys_pad, ys_lens, ctc.w, ctc.b, O)))
    val = float(loss)

    assert loss.shape == () and bool(jnp.isfinite(loss)) and val > 0.0
    assert abs(val - ref) <= 1e-3 + 5e-3 * abs(ref), (val, ref)
    print("KERNEL_OK")
</pallas_src>

<mosaic_0001>
module attributes {stable_mosaic.version = 11 : i64} {
  func.func @_proj_lsm_gather_kernel(%arg0: i32, %arg1: i32, %arg2: memref<1x8x32xbf16, #tpu.memory_space<vmem>>, %arg3: memref<32x16xbf16, #tpu.memory_space<vmem>>, %arg4: memref<1x16xf32, #tpu.memory_space<vmem>>, %arg5: memref<1x32x128xbf16, #tpu.memory_space<vmem>>, %arg6: memref<1x1x128xf32, #tpu.memory_space<vmem>>, %arg7: memref<1x8x128xf32, #tpu.memory_space<vmem>>) attributes {dimension_semantics = [#tpu.dimension_semantics<parallel>, #tpu.dimension_semantics<parallel>], iteration_bounds = array<i64: 8, 1>, scalar_prefetch = 0 : i64, scratch_operands = 0 : i64, tpu.core_type = #tpu.core_type<tc>, window_params = [{transform_indices = @transform_0, window_bounds = array<i64: 1, 8, 32>}, {pipeline_mode = #tpu.pipeline_mode<synchronous>, transform_indices = @transform_1, window_bounds = array<i64: 32, 16>}, {pipeline_mode = #tpu.pipeline_mode<synchronous>, transform_indices = @transform_2, window_bounds = array<i64: 1, 16>}, {transform_indices = @transform_3, window_bounds = array<i64: 1, 32, 128>}, {transform_indices = @transform_4, window_bounds = array<i64: 1, 1, 128>}, {transform_indices = @transform_5, window_bounds = array<i64: 1, 8, 128>}]} {
    %c0 = arith.constant 0 : index
    %c0_0 = arith.constant 0 : index
    %c0_1 = arith.constant 0 : index
    %0 = vector.load %arg2[%c0, %c0_0, %c0_1] : memref<1x8x32xbf16, #tpu.memory_space<vmem>>, vector<1x8x32xbf16>
    %1 = vector.shape_cast %0 : vector<1x8x32xbf16> to vector<8x32xbf16>
    %c0_2 = arith.constant 0 : index
    %c0_3 = arith.constant 0 : index
    %2 = vector.load %arg3[%c0_2, %c0_3] : memref<32x16xbf16, #tpu.memory_space<vmem>>, vector<32x16xbf16>
    %cst = arith.constant dense<0.000000e+00> : vector<8x16xf32>
    %3 = tpu.matmul %1, %2, %cst {dimension_numbers = #tpu.dot_dimension_numbers<[1], [0], [0], [1], [0, 0, 1, 1], [], []>} : vector<8x32xbf16>, vector<32x16xbf16>, vector<8x16xf32> -> vector<8x16xf32>
    %c0_4 = arith.constant 0 : index
    %c0_5 = arith.constant 0 : index
    %4 = vector.load %arg4[%c0_4, %c0_5] : memref<1x16xf32, #tpu.memory_space<vmem>>, vector<1x16xf32>
    %5 = vector.broadcast %4 : vector<1x16xf32> to vector<8x16xf32>
    %6 = arith.addf %3, %5 : vector<8x16xf32>
    %cst_6 = arith.constant dense<0xFF800000> : vector<8xf32>
    %7 = vector.multi_reduction <maximumf>, %6, %cst_6 [1] : vector<8x16xf32> to vector<8xf32>
    %8 = vector.shape_cast %7 : vector<8xf32> to vector<8x1xf32>
    %9 = vector.broadcast %8 : vector<8x1xf32> to vector<8x16xf32>
    %10 = arith.subf %6, %9 : vector<8x16xf32>
    %11 = math.exp %10 : vector<8x16xf32>
    %cst_7 = arith.constant dense<0.000000e+00> : vector<8xf32>
    %12 = vector.multi_reduction <add>, %11, %cst_7 [1] : vector<8x16xf32> to vector<8xf32>
    %13 = vector.shape_cast %12 : vector<8xf32> to vector<8x1xf32>
    %14 = math.log %13 : vector<8x1xf32>
    %15 = arith.addf %8, %14 : vector<8x1xf32>
    %c0_8 = arith.constant 0 : index
    %c0_9 = arith.constant 0 : index
    %c0_10 = arith.constant 0 : index
    %16 = vector.load %arg5[%c0_8, %c0_9, %c0_10] : memref<1x32x128xbf16, #tpu.memory_space<vmem>>, vector<1x32x128xbf16>
    %17 = vector.shape_cast %16 : vector<1x32x128xbf16> to vector<32x128xbf16>
    %cst_11 = arith.constant dense<0.000000e+00> : vector<8x128xf32>
    %18 = tpu.matmul %1, %17, %cst_11 {dimension_numbers = #tpu.dot_dimension_numbers<[1], [0], [0], [1], [0, 0, 1, 1], [], []>} : vector<8x32xbf16>, vector<32x128xbf16>, vector<8x128xf32> -> vector<8x128xf32>
    %c0_12 = arith.constant 0 : index
    %c0_13 = arith.constant 0 : index
    %c0_14 = arith.constant 0 : index
    %19 = vector.load %arg6[%c0_12, %c0_13, %c0_14] : memref<1x1x128xf32, #tpu.memory_space<vmem>>, vector<1x1x128xf32>
    %20 = vector.shape_cast %19 : vector<1x1x128xf32> to vector<1x128xf32>
    %21 = vector.broadcast %20 : vector<1x128xf32> to vector<8x128xf32>
    %22 = arith.addf %18, %21 : vector<8x128xf32>
    %23 = vector.broadcast %15 : vector<8x1xf32> to vector<8x128xf32>
    %24 = arith.subf %22, %23 : vector<8x128xf32>
    %c0_15 = arith.constant 0 : index
    %c0_16 = arith.constant 0 : index
    %c0_17 = arith.constant 0 : index
    %25 = vector.load %arg7[%c0_15, %c0_16, %c0_17] : memref<1x8x128xf32, #tpu.memory_space<vmem>>, vector<1x8x128xf32>
    %26 = vector.shape_cast %25 : vector<1x8x128xf32> to vector<8x128xf32>
    %27 = vector.shape_cast %24 : vector<8x128xf32> to vector<1x8x128xf32>
    tpu.vector_store %arg7[%c0_15, %c0_16, %c0_17], %27 {strides = array<i32>} : memref<1x8x128xf32, #tpu.memory_space<vmem>>, vector<1x8x128xf32>,
    return
  }
  func.func @transform_0(%arg0: i32, %arg1: i32) -> (i32, i32, i32) {
    %c0_i32 = arith.constant 0 : i32
    %c0_i32_0 = arith.constant 0 : i32
    return %arg0, %arg1, %c0_i32 : i32, i32, i32
  }
  func.func @transform_1(%arg0: i32, %arg1: i32) -> (i32, i32) {
    %c0_i32 = arith.constant 0 : i32
    %c0_i32_0 = arith.constant 0 : i32
    %c0_i32_1 = arith.constant 0 : i32
    return %c0_i32, %c0_i32_0 : i32, i32
  }
  func.func @transform_2(%arg0: i32, %arg1: i32) -> (i32, i32) {
    %c0_i32 = arith.constant 0 : i32
    %c0_i32_0 = arith.constant 0 : i32
    %c0_i32_1 = arith.constant 0 : i32
    return %c0_i32, %c0_i32_0 : i32, i32
  }
  func.func @transform_3(%arg0: i32, %arg1: i32) -> (i32, i32, i32) {
    %c0_i32 = arith.constant 0 : i32
    %c0_i32_0 = arith.constant 0 : i32
    %c0_i32_1 = arith.constant 0 : i32
    return %arg0, %c0_i32, %c0_i32_0 : i32, i32, i32
  }
  func.func @transform_4(%arg0: i32, %arg1: i32) -> (i32, i32, i32) {
    %c0_i32 = arith.constant 0 : i32
    %c0_i32_0 = arith.constant 0 : i32
    %c0_i32_1 = arith.constant 0 : i32
    return %arg0, %c0_i32, %c0_i32_0 : i32, i32, i32
  }
  func.func @transform_5(%arg0: i32, %arg1: i32) -> (i32, i32, i32) {
    %c0_i32 = arith.constant 0 : i32
    %c0_i32_0 = arith.constant 0 : i32
    return %arg0, %arg1, %c0_i32 : i32, i32, i32
  }
}

</mosaic_0001>

<bundles_post_ra>
// kernel: tpu_custom_call.1
= control target key start
LH: loop header
LB: loop body
LE: loop exit
PB: predicated region body
PF: predicated region fallthrough
CT: control target
= control target key end

     0   :  { %10 = vsyncpa [#allocation3], 0  ;;  %s1133_s0 = inlined_call_operand.hbm [shape: bf16[8,8,32], index: 0, kind: input, shape index: {}]   ;;  %s1134_s1 = inlined_call_operand.vmem [shape: bf16[32,16], index: 1, kind: input, shape index: {}]   ;;  %s1135_s2 = inlined_call_operand.vmem [shape: f32[1,16], index: 2, kind: input, shape index: {}]   ;;  %s1136_s3 = inlined_call_operand.hbm [shape: bf16[8,32,128], index: 3, kind: input, shape index: {}]   ;;  %s1137_s4 = inlined_call_operand.vmem [shape: f32[8,1,128], index: 4, kind: input, shape index: {}]   ;;  %s1138_s5 = inlined_call_operand.hbm [shape: f32[8,8,128], index: 5, kind: output, shape index: {}]  }
   0x1   :  { %12 = vsyncpa [#allocation3 + $0x1], 0 }
   0x2   :  { %13 = vsyncpa [#allocation6], 0 }
   0x3   :  { %15 = vsyncpa [#allocation6 + $0x1], 0 }
   0x4   :  { %16 = vsyncpa [#allocation4], 0 }
   0x5   :  { %18 = vsyncpa [#allocation4 + $0x1], 0  ;;  %s897_s18 = smov 0   ;;  %s899_s19 = smov 0  }
   0x6   :  { %s901_s20 = smov 0   ;;  %s903_s21 = smov 0  }
   0x7   :  { %s905_s22 = smov 0   ;;  %s907_s23 = smov 0  }
   0x8 LB: > { %s585_s24 = sadd.s32 4294967295, %s858_s23   ;;  %s586_s25 = sadd.s32 4294967294, %s858_s23   ;;  %s858_s23 = sphi %s907_s23, %s24_s23   ;;  %s854_s22 = sphi %s905_s22, %s1156_s22   ;;  %s850_s21 = sphi %s903_s21, %s1155_s21   ;;  %s846_s20 = sphi %s901_s20, %s1154_s20   ;;  %s842_s19 = sphi %s899_s19, %s1153_s19   ;;  %s838_s18 = sphi %s897_s18, %s1152_s18  }
   0x9   : > { %s36_s26 = sadd.s32 1, %s854_s22  ;;  %s45_s27 = sadd.s32 1, %s846_s20 }
   0xa   : > { %p38_p0 = scmp.ge.s32.totalorder %s36_s26, 8  ;;  %p52_p1 = scmp.ne.s32.totalorder %s846_s20, %s842_s19 }
   0xb   : > { %p53_p2 = scmp.eq.s32.totalorder %s858_s23, 0  ;;  %p58_p3 = scmp.ne.s32.totalorder %s842_s19, %s838_s18 }
   0xc   : > { %s1158_s26 = smov (%p38_p0, %s36_s26), 0  ;;  %p59_p5 = scmp.eq.s32.totalorder %s585_s24, 0 }
   0xd   : > { %p938_p4 = por %p53_p2, %p52_p1  ;;  %s40_s29 = ssub.s32 %s854_s22, %s1158_s26 }
   0xe   : > { %p178_p6 = scmp.eq.s32.totalorder %s585_s24, 7  ;;  %p43_p7 = scmp.eq.s32.totalorder %s40_s29, 0 }
   0xf   : > { %p944_p8 = por %p59_p5, %p58_p3  ;;  %p184_p10 = scmp.eq.s32.totalorder %s586_s25, 7 }
  0x10   : > { %p948_p9 = por %p178_p6, %p52_p1  ;;  %p650_p12 = scmp.lt.s32.totalorder %s858_s23, 8 }
  0x11   : > { %s1142_s30 = scalar_select %p944_p8, 1, 0 }
  0x12   : > { %s1143_s6 = scalar_select %p948_p9, 1, 0 }
  0x13   : > { %s953_s7 = scalar_select %p43_p7, %s846_s20, %s45_s27  }
  0x14   : > { %p955_p11 = por %p184_p10, %p58_p3  ;;  %s961_s9 = sand.u32 1, %s846_s20  }
  0x15   : > { %s589_s10 = sshll.u32 %s961_s9, 2  ;;  %s590_s11 = sshll.u32 %s854_s22, 6 }
  0x16   : > { %s1144_s8 = scalar_select %p955_p11, 1, 0 }
  0x17   : > { %s968_s14 = scalar_lea.hbm %s1133_s0, %s590_s11  ;;  %s214_s15 = scalar_lea.vmem [#allocation2], %s589_s10 }
  0x18   : > { %s222_s16 = sshll.u32 %s214_s15, 4  ;;  %p974_p13 = pnand %p650_p12, %p938_p4  ;;  %s970_s16 = int_to_ptr.vmem [resolvable:$true] %s222_s16 }
  0x19   : > { %s211_s24 = scalar_lea.sflag [#allocation3], %s961_s9  ;;  %s712_s25 = scalar_lea.hbm %s968_s14, 64 }
  0x1a   : > { %p713_p2 = scmp.ne.s32.totalorder %s968_s14, %s712_s25  ;;  %p714_p3 = pneg %p974_p13 }
  0x1b   : > { %s717_s28 = scalar_lea.hbm %s1133_s0, 512  ;;  %p718_p4 = scmp.lt.u32.totalorder %s968_s14, %s1133_s0 }
  0x1c   : > { %p715_p5 = pnand %p714_p3, %p713_p2  ;;  %p719_p7 = scmp.lt.u32.totalorder %s717_s28, %s712_s25 }
  0x1d   : > { %p721_p12 = scmp.lt.u32.totalorder %s712_s25, %s968_s14 }
  0x1e   : > { %p716_p6 = pneg %p715_p5  ;;  %p720_p10 = por %p719_p7, %p718_p4 }
  0x20   : > { %p722_p0 = por %p721_p12, %p720_p10 }
  0x22   : > { %p723_p1 = pnand %p722_p0, %p716_p6 }
  0x24   : > { %726 = shalt.err (!%p723_p1)
}
  0x25   : > { %s727_s12 = scalar_lea.vmem %s970_s16, 64  ;;  %s860_s13 = smov [#allocation2]  }
  0x26   : > { %p728_p2 = scmp.ne.s32.totalorder %s970_s16, %s727_s12  ;;  %s732_s15 = sshll.u32 %s860_s13, 4  ;;  %s733_s15 = int_to_ptr.vmem [resolvable:$false] %s732_s15 }
  0x27   : > { %s734_s27 = scalar_lea.vmem %s733_s15, 128  ;;  %p735_p9 = scmp.lt.s32.totalorder %s970_s16, %s733_s15 }
  0x28   : > { %p730_p5 = pnand %p728_p2, %p714_p3  ;;  %p736_p4 = scmp.lt.s32.totalorder %s734_s27, %s727_s12 }
  0x2a   : > { %p731_p11 = pneg %p730_p5  ;;  %p737_p7 = por %p736_p4, %p735_p9 }
  0x2c   : > { %p738_p10 = pnand %p737_p7, %p731_p11 }
  0x2e   : > { %741 = shalt.err (!%p738_p10)
}
  0x2f   : > { %642 = dma.hbm_to_vmem [thread:$0]  (!%p974_p13), %s968_s14, 64, %s970_s16, %s211_s24  }
  0x30   : > { %p1146_p0 = scmp.lt.s32.totalorder %s858_s23, 9  ;;  %p1147_p1 = scmp.ge.s32.totalorder %s858_s23, 1 }
  0x31   : > { %s591_s29 = sshll.u32 %s961_s9, 4  ;;  %s610_s28 = sshll.u32 %s854_s22, 8 }
  0x32   : > { %p1010_p6 = pnand %p1147_p1, %p1146_p0  ;;  %s1019_s12 = scalar_lea.hbm %s1136_s3, %s610_s28 }
  0x33   : > { %s233_s13 = scalar_lea.vmem [#allocation5], %s591_s29  ;;  %s230_s14 = scalar_lea.sflag [#allocation6], %s961_s9 }
  0x34   : > { %s240_s15 = sshll.u32 %s233_s13, 4  ;;  %s742_s16 = scalar_lea.hbm %s1019_s12, 256  ;;  %s1021_s15 = int_to_ptr.vmem [resolvable:$true] %s240_s15 }
  0x35   : > { %p743_p9 = scmp.ne.s32.totalorder %s1019_s12, %s742_s16  ;;  %s747_s28 = scalar_lea.hbm %s1136_s3, 2048 }
  0x36   : > { %p748_p2 = scmp.lt.u32.totalorder %s1019_s12, %s1136_s3  ;;  %p749_p5 = scmp.lt.u32.totalorder %s747_s28, %s742_s16 }
  0x37   : > { %p745_p11 = pnand %p743_p9, %p714_p3  ;;  %p751_p7 = scmp.lt.u32.totalorder %s742_s16, %s1019_s12 }
  0x38   : > { %p750_p4 = por %p749_p5, %p748_p2 }
  0x39   : > { %p746_p12 = pneg %p745_p11 }
  0x3a   : > { %p752_p10 = por %p751_p7, %p750_p4 }
  0x3c   : > { %p753_p0 = pnand %p752_p10, %p746_p12 }
  0x3e   : > { %756 = shalt.err (!%p753_p0)
}
  0x3f   : > { %s757_s29 = scalar_lea.vmem %s1021_s15, 256  ;;  %s861_s13 = smov [#allocation5]  }
  0x40   : > { %p758_p1 = scmp.ne.s32.totalorder %s1021_s15, %s757_s29  ;;  %s762_s24 = sshll.u32 %s861_s13, 4  ;;  %s763_s24 = int_to_ptr.vmem [resolvable:$false] %s762_s24 }
  0x41   : > { %s764_s27 = scalar_lea.vmem %s763_s24, 512  ;;  %p765_p8 = scmp.lt.s32.totalorder %s1021_s15, %s763_s24 }
  0x42   : > { %p760_p9 = pnand %p758_p1, %p714_p3  ;;  %p766_p2 = scmp.lt.s32.totalorder %s764_s27, %s757_s29 }
  0x44   : > { %p761_p11 = pneg %p760_p9  ;;  %p767_p5 = por %p766_p2, %p765_p8 }
  0x46   : > { %p768_p4 = pnand %p767_p5, %p761_p11 }
  0x48   : > { %771 = shalt.err (!%p768_p4)
}
  0x49   : > { %s862_s16 = smov 64   ;;  %s863_s28 = smov 4  }
  0x4a   : > { %645 = dma.hbm_to_vmem [thread:$0]  (!%p974_p13), %s1019_s12, 256, %s1021_s15, %s230_s14, %s862_s16, %s862_s16, %s863_s28  }
  0x4b   : > { %258 = sbr.rel (%p1010_p6) target bundleno = 642 (0x282), region = 40  ;;  %s1052_s10 = sand.u32 (!%p1010_p6), 1, %s842_s19  }
  0x4c   : > { %s595_s11 = sshll.u32 (!%p1010_p6), %s1052_s10, 2  ;;  %s261_s29 = scalar_lea.sflag (!%p1010_p6), [#allocation3], %s1052_s10 }
  0x4d   : > { %s264_s13 = scalar_lea.vmem (!%p1010_p6), [#allocation2], %s595_s11  ;;  %p1149_p8 = scmp.ne.s32.totalorder (!%p1010_p6), %s1142_s30, 0 }
  0x52   : > { %825 = dma.done.wait (%p1149_p8), %s261_s29, 64  }
  0x53   : > { %827 = vsyncadd (%p1149_p8), %s261_s29, 4294967232  ;;  %s596_s9 = sshll.u32 %s1052_s10, 4  ;;  %s270_s17 = scalar_lea.sflag [#allocation6], %s1052_s10 }
  0x54   : > { %s273_s25 = scalar_lea.vmem [#allocation5], %s596_s9 }
  0x55   : > { %829 = dma.done.wait (%p1149_p8), %s270_s17, 256  }
  0x56   : > { %831 = vsyncadd (%p1149_p8), %s270_s17, 4294967040  ;;  %v864_v0 = vmov 0.0   ;;  %vm865_vm0 = vmmov 0   ;;  %v704_v1 = vld [vmem:[%s1134_s1] sm:$0xff]   ;;  %v705_v2 = vld [vmem:[%s1134_s1 + $0x8] sm:$0xff]   ;;  %vm336_vm1 = vcmask 261120  }
  0x57   : > { %617 = vmatprep.subr.bf16.mxu0 %v864_v0  ;;  %621 = vmatprep.mubr.msk.bf16.mxu0 %vm865_vm0, %v864_v0  ;;  %v312_v3 = vld [vmem:[%s264_s13] sm:$0xf]  ;;  %v706_v4 = vld [vmem:[%s273_s25] sm:$0xff]   ;;  %vm380_vm2 = vcmask 130048   ;;  %p308_p13 = scmp.lt.s32.totalorder %s850_s21, 7  ;;  %s597_s13 = sshll.u32 %s1052_s10, 3 }
  0x58   : > { %625 = vmatprep.subr.bf16.mxu1 %v864_v0  ;;  %629 = vmatprep.mubr.msk.bf16.mxu1 %vm865_vm0, %v864_v0  ;;  %v707_v5 = vld [vmem:[%s273_s25 + $0x8] sm:$0xff]   ;;  %s607_s9 = sshll.u32 %s850_s21, 7  ;;  %s307_s17 = scalar_lea.vmem [#allocation7], %s597_s13 }
  0x59   : > { %618 = vmatpush3.bf16.msra.mxu0 %v704_v1  ;;  %626 = vmatpush3.bf16.msra.mxu1 %v706_v4  ;;  %v598_v6 = vld [vmem:[%s1135_s2] ss:$0 sm:$0xff]  ;;  %s309_s16 = scalar_select %p308_p13, %s850_s21, 7 }
  0x5a   : > { %619 = vmatprep.subr.bf16.mxu0 %v864_v0  ;;  %627 = vmatprep.subr.bf16.mxu1 %v864_v0  ;;  %s473_s25 = sshll.u32 %s307_s17, 4  ;;  %s1085_s14 = scalar_lea.hbm %s1138_s5, %s607_s9  ;;  %s1087_s25 = int_to_ptr.vmem [resolvable:$true] %s473_s25 }
  0x5b   : > { %s310_s29 = scalar_lea.vmem %s1137_s4, %s309_s16  ;;  %s459_s24 = scalar_lea.sflag [#allocation4], %s1052_s10 }
  0x5c   : > { %v602_v23 = vld [vmem:[%s310_s29] ss:$0 sm:$0xff]  ;;  %s772_s30 = scalar_lea.vmem %s1087_s25, 128  ;;  %p1150_p6 = scmp.ne.s32.totalorder %s1143_s6, 0 }
  0x5d   : > { %620 = vmatpush3.bf16.msra.mxu0 %v705_v2  ;;  %628 = vmatpush3.bf16.msra.mxu1 %v707_v5  ;;  %p773_p3 = scmp.ne.s32.totalorder %s1087_s25, %s772_s30  ;;  %s866_s21 = smov [#allocation7]  }
  0x5e   : > { %s776_s27 = sshll.u32 %s866_s21, 4  ;;  %s777_s27 = int_to_ptr.vmem [resolvable:$false] %s776_s27 }
  0x5f   : > { %p774_p12 = pnand %p773_p3, %p1150_p6  ;;  %s778_s16 = scalar_lea.vmem %s777_s27, 256 }
  0x60   : > { %622 = vmatmul.mubr.msk.bf16.vlgmr.msra.gmra.mrb[0].mxu0 %vm336_vm1, %v312_v3  ;;  %630 = vmatmul.mubr.msk.bf16.vlgmr.msra.gmra.mrb[0].mxu1 %vm336_vm1, %v312_v3  ;;  %p779_p10 = scmp.lt.s32.totalorder %s1087_s25, %s777_s27  ;;  %p780_p0 = scmp.lt.s32.totalorder %s778_s16, %s772_s30 }
  0x61   : > { %p775_p7 = pneg %p774_p12 }
  0x62   : > { %p781_p1 = por %p780_p0, %p779_p10 }
  0x64   : > { %p782_p9 = pnand %p781_p1, %p775_p7 }
 0x133   : > { %v374_v7 = vpop.f32.mrb[0].mxu0  ;;  %v450_v18 = vpop.f32.mrb[0].mxu1 }
 0x134   : > { %v375_v8 = vadd.f32 %v598_v6, %v374_v7  ;;  %v623_v9 = vpop.f32.mrb[1].mxu0  ;;  %v631_v19 = vpop.f32.mrb[1].mxu1  ;;  %v451_v26 = vadd.f32 %v602_v23, %v450_v18 }
 0x135   : > { %v377_v10 = vpop.f32.mrb[2].mxu0  ;;  %v453_v20 = vpop.f32.mrb[2].mxu1 }
 0x136   : > { %v624_v11 = vpop.f32.mrb[3].mxu0  ;;  %v381_v12 = vsel %vm380_vm2, %v375_v8, -inf  ;;  %v632_v21 = vpop.f32.mrb[3].mxu1 }
 0x137   : > { %382 = vmax.xlane.f32.xlu0 %v381_v12 }
 0x1c4   : > { %v383_v13 = vpop.xlane.xlu0 %382 }
 0x1c5   : > { %v384_v14 = vsub.f32 %v375_v8, %v383_v13 }
 0x1c7   : > { %v385_v15 = vmul.f32 1.442695, %v384_v14 }
 0x1c9   : > { %708 = vpow2.f32 %v385_v15 }
 0x1d3   : > { %v709_v16 = vpop.eup %708 }
 0x1d4   : > { %v387_v17 = vsel %vm380_vm2, %v709_v16, 0.0 }
 0x1d5   : > { %388 = vadd.xlane.f32.xlu0 %v387_v17 }
 0x262   : > { %v389_v22 = vpop.xlane.xlu0 %388 }
 0x263   : > { %710 = vlog2.f32 %v389_v22 }
 0x26d   : > { %v711_v24 = vpop.eup %710 }
 0x26e   : > { %v391_v25 = vmul.f32 0.6931472, %v711_v24 }
 0x270   : > { %v392_v27 = vadd.f32 %v391_v25, %v383_v13 }
 0x272   : > { %v456_v28 = vsub.f32 %v451_v26, %v392_v27 }
 0x274   : > { %457 = vst [vmem:[%s307_s17] sm:$0xff] %v456_v28 }
 0x275   : > { %785 = shalt.err (!%p782_p9)
}
 0x276   : > { %s786_s10 = scalar_lea.hbm %s1085_s14, 128  ;;  %s790_s29 = scalar_lea.hbm %s1138_s5, 1024 }
 0x277   : > { %p787_p11 = scmp.ne.s32.totalorder %s1085_s14, %s786_s10  ;;  %p791_p4 = scmp.lt.u32.totalorder %s1085_s14, %s1138_s5 }
 0x278   : > { %p792_p8 = scmp.lt.u32.totalorder %s790_s29, %s786_s10  ;;  %p794_p3 = scmp.lt.u32.totalorder %s786_s10, %s1085_s14 }
 0x279   : > { %p788_p2 = pnand %p787_p11, %p1150_p6 }
 0x27a   : > { %p793_p13 = por %p792_p8, %p791_p4 }
 0x27b   : > { %p789_p5 = pneg %p788_p2 }
 0x27c   : > { %p795_p12 = por %p794_p3, %p793_p13 }
 0x27e   : > { %p796_p7 = pnand %p795_p12, %p789_p5 }
 0x280   : > { %799 = shalt.err (!%p796_p7)
}
 0x281   : > { %637 = dma.vmem_to_hbm [thread:$0]  (%p1150_p6), %s1087_s25, 128, %s1085_s14, %s459_s24  }
 0x282 PF: > { %p651_p10 = scmp.ge.s32.totalorder %s858_s23, 2  ;;  %s485_s17 = sand.u32 1, %s838_s18  }
 0x283   : > { %p1151_p0 = scmp.ne.s32.totalorder %s1144_s8, 0  ;;  %s486_s12 = scalar_lea.sflag [#allocation4], %s485_s17 }
 0x285   : > { %p647_p1 = pnand %p651_p10, %p1151_p0 }
 0x287   : > { %833 = dma.done.wait (!%p647_p1), %s486_s12, 128  }
 0x288   : > { %835 = vsyncadd (!%p647_p1), %s486_s12, 4294967168  ;;  %s24_s23 = sadd.s32 1, %s858_s23   ;;  %s1152_s18 = smov %s842_s19 }
 0x289   : > { %p21_p9 = scmp.ge.s32.totalorder %s24_s23, 10   ;;  %s1153_s19 = smov %s846_s20 }
 0x28a   : > { %s1154_s20 = smov %s953_s7  ;;  %s1155_s21 = smov %s854_s22 }
 0x28b   : > { %s1156_s22 = smov %s1158_s26  ;;  %23 = sbr.rel (!%p21_p9) target bundleno = 8 (0x8), region = 101 }
 0x292   :  { %491 = vsyncpa [#allocation3], 1 }
 0x293   :  { %493 = vsyncpa [#allocation3 + $0x1], 1 }
 0x294   :  { %494 = vsyncpa [#allocation6], 1 }
 0x295   :  { %496 = vsyncpa [#allocation6 + $0x1], 1 }
 0x296   :  { %497 = vsyncpa [#allocation4], 1 }
 0x297   :  { %499 = vsyncpa [#allocation4 + $0x1], 1 }

</bundles_post_ra>
